<compile_context>
chip_gen: v7x
topology: tpu7x:2x2x1
jax: 0.10.0
libtpu: 0.0.40
codegen_flags: <defaults>
</compile_context>

<pallas_src>
import functools

import jax
import jax.numpy as jnp
from jax import lax
from jax.experimental import pallas as pl
from jax.experimental.pallas import tpu as pltpu


# ---------------------------------------------------------------------------
# Kernels
# ---------------------------------------------------------------------------

def _rln_block_kernel(x_ref, w_ref, b_ref, o_ref, *, eps, inv_n):
    """Whole-sample(s) kernel.

    x_ref : (nb, S, L)  -- nb complete samples per grid step
    w_ref : (1, Sw, Lw) -- broadcastable against x (per-channel (1,C,1) or
                           per-element lane-folded (1, R, 128))
    """
    inv_nf = jnp.float32(inv_n)

    # Pass 1: mean.  The f32 upcast is consumed by the reduction; subsequent
    # passes re-read the (narrow-dtype) VMEM block instead of keeping a full
    # f32 copy live across reduction + store (VMEM vld is not the bottleneck,
    # HBM DMA is).
    mean = jnp.sum(x_ref[...].astype(jnp.float32),
                   axis=(1, 2), keepdims=True) * inv_nf        # (nb,1,1)

    # Pass 2: numerically-stable two-pass variance (matches reference form).
    d = x_ref[...].astype(jnp.float32) - mean
    var = jnp.sum(d * d, axis=(1, 2), keepdims=True) * inv_nf  # (nb,1,1)
    inv_std = lax.rsqrt(var + jnp.float32(eps))

    # Pass 3: normalize + affine.
    xn = (x_ref[...].astype(jnp.float32) - mean) * inv_std
    o_ref[...] = (xn * w_ref[...].astype(jnp.float32)
                  + b_ref[...].astype(jnp.float32)).astype(o_ref.dtype)


def _rln_stats_kernel(x_ref, stats_ref, s_ref, ss_ref, *, eps, inv_n):
    """Pass 1 of the large-sample path: reduce HW tiles -> per-sample stats.

    grid = (N, T); x_ref: (1, C, thw); stats_ref: (1, 2, 128) (row 0 = mean,
    row 1 = inv_std, replicated across lanes); s_ref/ss_ref: (1,1,128) VMEM
    scratch accumulators.
    """
    t = pl.program_id(1)

    @pl.when(t == 0)
    def _init():
        s_ref[...] = jnp.zeros_like(s_ref)
        ss_ref[...] = jnp.zeros_like(ss_ref)

    xf = x_ref[...].astype(jnp.float32)
    s_ref[...] = s_ref[...] + jnp.sum(xf, axis=(1, 2), keepdims=True)
    ss_ref[...] = ss_ref[...] + jnp.sum(xf * xf, axis=(1, 2), keepdims=True)

    @pl.when(t == pl.num_programs(1) - 1)
    def _finalize():
        inv_nf = jnp.float32(inv_n)
        mean = s_ref[...] * inv_nf                               # (1,1,128)
        # Single-pass variance across tiles (guarded against tiny negatives).
        # TODO(synk): add a third traversal ((x - mean)^2) if bit-level parity
        # with the two-pass reference is required for ill-conditioned inputs.
        var = jnp.maximum(ss_ref[...] * inv_nf - mean * mean, 0.0)
        inv_std = lax.rsqrt(var + jnp.float32(eps))
        stats_ref[...] = jnp.concatenate([mean, inv_std], axis=1)  # (1,2,128)


def _rln_apply_kernel(x_ref, stats_ref, w_ref, b_ref, o_ref):
    """Pass 2 of the large-sample path: apply normalization + affine per tile."""
    stats = stats_ref[...]                                        # (1,2,128), lanes replicated
    # All lanes hold the same value; a cross-lane max extracts it exactly.
    mean = jnp.max(stats[:, 0:1, :], axis=2, keepdims=True)       # (1,1,1)
    inv_std = jnp.max(stats[:, 1:2, :], axis=2, keepdims=True)    # (1,1,1)
    xn = (x_ref[...].astype(jnp.float32) - mean) * inv_std
    o_ref[...] = (xn * w_ref[...].astype(jnp.float32)
                  + b_ref[...].astype(jnp.float32)).astype(o_ref.dtype)


# ---------------------------------------------------------------------------
# Wrappers
# ---------------------------------------------------------------------------

def _largest_divisor_leq(n, cap):
    cap = max(1, min(cap, n))
    for d in range(cap, 0, -1):
        if n % d == 0:
            return d
    return 1


def _rln_whole_samples(x, weight, bias, eps, target_block_bytes):
    N, C, H, W = x.shape
    HW = H * W
    n_elems = C * HW
    itemsize = jnp.dtype(x.dtype).itemsize
    bytes_per_sample = n_elems * itemsize

    # Samples per grid step: a divisor of N (no host-side padding / extra HBM
    # traffic), small enough for ~target_block_bytes blocks, and leaving
    # >= min(N, 8) grid steps for pipeline depth / v7x megacore balance.
    budget_cap = max(1, target_block_bytes // max(1, bytes_per_sample))
    step_cap = max(1, N // min(N, 8))
    nb = _largest_divisor_leq(N, min(budget_cap, step_cap))

    # Layout: last two block dims map to (sublane, lane).  For small C (< 8
    # sublanes) fold C into the lane axis -> (N, C*HW/128, 128) with per-element
    # weight/bias rows, restoring full (8,128) vreg occupancy.
    fold = (C < 8) and (n_elems % 128 == 0) and (n_elems * 4 <= (1 << 20))
    if fold:
        R = n_elems // 128
        x3 = x.reshape(N, R, 128)
        w3 = jnp.repeat(weight.reshape(C).astype(jnp.float32), HW).reshape(1, R, 128)
        b3 = jnp.repeat(bias.reshape(C).astype(jnp.float32), HW).reshape(1, R, 128)
        S, L = R, 128
    else:
        x3 = x.reshape(N, C, HW)
        w3 = weight.reshape(1, C, 1)
        b3 = bias.reshape(1, C, 1)
        S, L = C, HW

    block_bytes = nb * bytes_per_sample
    f32_block = nb * n_elems * 4
    wb_bytes = 2 * int(w3.size) * jnp.dtype(w3.dtype).itemsize
    # 2x in + 2x out (double-buffered) + f32 temps + w/b + slack.  Blocks are
    # capped at ~target_block_bytes, so this stays far below v7x's 64 MiB VMEM.
    needed = 4 * block_bytes + 3 * f32_block + 2 * wb_bytes + (2 << 20)
    vmem_limit = int(max(needed, 16 * 1024 * 1024))

    kernel = functools.partial(_rln_block_kernel, eps=float(eps),
                               inv_n=1.0 / n_elems)
    out3 = pl.pallas_call(
        kernel,
        out_shape=jax.ShapeDtypeStruct((N, S, L), x.dtype),
        grid_spec=pl.GridSpec(
            grid=(N // nb,),
            in_specs=[
                pl.BlockSpec((nb, S, L), lambda i: (i, 0, 0)),
                pl.BlockSpec(w3.shape, lambda i: (0, 0, 0)),
                pl.BlockSpec(b3.shape, lambda i: (0, 0, 0)),
            ],
            out_specs=pl.BlockSpec((nb, S, L), lambda i: (i, 0, 0)),
        ),
        compiler_params=pltpu.CompilerParams(
            dimension_semantics=("parallel",),
            vmem_limit_bytes=vmem_limit,
        ),
    )(x3, w3, b3)
    return out3.reshape(N, C, H, W)


def _rln_tiled(x, weight, bias, eps, target_block_bytes):
    """Large-sample path: one sample exceeds the block budget, so tile HW.

    Two memory-bound passes (2 reads + 1 write of x total): pass 1 reduces HW
    tiles into per-sample (mean, inv_std); pass 2 applies normalization+affine.
    """
    N, C, H, W = x.shape
    HW = H * W
    n_elems = C * HW
    itemsize = jnp.dtype(x.dtype).itemsize

    # Largest multiple-of-128 divisor of HW whose (C, thw) tile fits the budget.
    thw = 128
    t = 128
    while t <= HW:
        if HW % t == 0 and C * t * itemsize <= target_block_bytes:
            thw = t
        t += 128
    T = HW // thw

    x3 = x.reshape(N, C, HW)
    w3 = weight.reshape(1, C, 1)
    b3 = bias.reshape(1, C, 1)

    tile_bytes = C * thw * itemsize
    vmem_limit = int(max(4 * tile_bytes + 3 * C * thw * 4 + (2 << 20),
                         16 * 1024 * 1024))

    stats = pl.pallas_call(
        functools.partial(_rln_stats_kernel, eps=float(eps), inv_n=1.0 / n_elems),
        out_shape=jax.ShapeDtypeStruct((N, 2, 128), jnp.float32),
        grid_spec=pltpu.PrefetchScalarGridSpec(
            num_scalar_prefetch=0,
            grid=(N, T),
            in_specs=[pl.BlockSpec((1, C, thw), lambda i, t: (i, 0, t))],
            out_specs=pl.BlockSpec((1, 2, 128), lambda i, t: (i, 0, 0)),
            scratch_shapes=[pltpu.VMEM((1, 1, 128), jnp.float32),
                            pltpu.VMEM((1, 1, 128), jnp.float32)],
        ),
        compiler_params=pltpu.CompilerParams(
            dimension_semantics=("parallel", "arbitrary"),
            vmem_limit_bytes=vmem_limit,
        ),
    )(x3)

    out3 = pl.pallas_call(
        _rln_apply_kernel,
        out_shape=jax.ShapeDtypeStruct((N, C, HW), x.dtype),
        grid_spec=pl.GridSpec(
            grid=(N, T),
            in_specs=[
                pl.BlockSpec((1, C, thw), lambda i, t: (i, 0, t)),
                pl.BlockSpec((1, 2, 128), lambda i, t: (i, 0, 0)),
                pl.BlockSpec((1, C, 1), lambda i, t: (0, 0, 0)),
                pl.BlockSpec((1, C, 1), lambda i, t: (0, 0, 0)),
            ],
            out_specs=pl.BlockSpec((1, C, thw), lambda i, t: (i, 0, t)),
        ),
        compiler_params=pltpu.CompilerParams(
            dimension_semantics=("parallel", "parallel"),
            vmem_limit_bytes=vmem_limit,
        ),
    )(x3, stats, w3, b3)
    return out3.reshape(N, C, H, W)


def rln_forward(x, weight, bias, eps=1e-5, target_block_bytes=2 * 1024 * 1024):
    """x: (N, C, H, W); weight, bias: (1, C, 1, 1).  Output dtype == x.dtype."""
    N, C, H, W = x.shape
    HW = H * W
    itemsize = jnp.dtype(x.dtype).itemsize
    bytes_per_sample = C * HW * itemsize

    if bytes_per_sample > target_block_bytes and HW % 128 == 0:
        return _rln_tiled(x, weight, bias, eps, target_block_bytes)
    # (If a huge sample is not 128-tileable, this path processes it whole; the
    # computed vmem_limit simply grows — best effort.)
    return _rln_whole_samples(x, weight, bias, eps, target_block_bytes)


def rln_reference(x, weight, bias, eps=1e-5):
    xf = x.astype(jnp.float32)
    mean = jnp.mean(xf, axis=(1, 2, 3), keepdims=True)
    std = jnp.sqrt(jnp.mean((xf - mean) ** 2, axis=(1, 2, 3), keepdims=True) + eps)
    return ((xf - mean) / std) * weight + bias


if __name__ == "__main__":
    root = jax.random.PRNGKey(0)

    def run_case(idx, N, C, H, W, module_init=True, **kw):
        kx, kw_, kb = jax.random.split(jax.random.fold_in(root, idx), 3)
        x = jax.random.normal(kx, (N, C, H, W), dtype=jnp.float32)
        if module_init:
            # Matches nn.Module.__init__: ones / zeros.
            weight = jnp.ones((1, C, 1, 1), dtype=jnp.float32)
            bias = jnp.zeros((1, C, 1, 1), dtype=jnp.float32)
        else:
            weight = 1.0 + 0.1 * jax.random.normal(kw_, (1, C, 1, 1), jnp.float32)
            bias = 0.1 * jax.random.normal(kb, (1, C, 1, 1), jnp.float32)
        out = jax.block_until_ready(rln_forward(x, weight, bias, eps=1e-5, **kw))
        ref = rln_reference(x, weight, bias, eps=1e-5)
        assert out.shape == (N, C, H, W)
        assert jnp.allclose(out, ref, atol=1e-4, rtol=1e-4), \
            f"mismatch for shape {(N, C, H, W)} kwargs={kw}"

    # Primary case (module-consistent small shape): lane-folded whole-sample path.
    run_case(0, 2, 4, 16, 16)
    # Channel-layout whole-sample path (C >= 8), non-trivial affine params.
    run_case(1, 2, 8, 8, 8, module_init=False)
    # Large-sample tiled (two-pass) path, forced at small shape via tiny budget.
    run_case(2, 2, 4, 16, 16, module_init=False, target_block_bytes=1024)

    print("KERNEL_OK")
</pallas_src>

<mosaic_0001>
module attributes {stable_mosaic.version = 11 : i64} {
  func.func @_rln_block_kernel(%arg0: i32, %arg1: memref<1x8x128xf32, #tpu.memory_space<vmem>>, %arg2: memref<1x8x128xf32, #tpu.memory_space<vmem>>, %arg3: memref<1x8x128xf32, #tpu.memory_space<vmem>>, %arg4: memref<1x8x128xf32, #tpu.memory_space<vmem>>) attributes {dimension_semantics = [#tpu.dimension_semantics<parallel>], iteration_bounds = array<i64: 2>, scalar_prefetch = 0 : i64, scratch_operands = 0 : i64, tpu.core_type = #tpu.core_type<tc>, window_params = [{transform_indices = @transform_0, window_bounds = array<i64: 1, 8, 128>}, {pipeline_mode = #tpu.pipeline_mode<synchronous>, transform_indices = @transform_1, window_bounds = array<i64: 1, 8, 128>}, {pipeline_mode = #tpu.pipeline_mode<synchronous>, transform_indices = @transform_2, window_bounds = array<i64: 1, 8, 128>}, {transform_indices = @transform_3, window_bounds = array<i64: 1, 8, 128>}]} {
    %c0 = arith.constant 0 : index
    %c0_0 = arith.constant 0 : index
    %c0_1 = arith.constant 0 : index
    %0 = vector.load %arg1[%c0, %c0_0, %c0_1] : memref<1x8x128xf32, #tpu.memory_space<vmem>>, vector<1x8x128xf32>
    %cst = arith.constant dense<0.000000e+00> : vector<1xf32>
    %1 = vector.multi_reduction <add>, %0, %cst [1, 2] : vector<1x8x128xf32> to vector<1xf32>
    %2 = vector.shape_cast %1 : vector<1xf32> to vector<1x1x1xf32>
    %cst_2 = arith.constant 9.765625E-4 : f32
    %3 = vector.broadcast %cst_2 : f32 to vector<1x1x1xf32>
    %4 = arith.mulf %2, %3 : vector<1x1x1xf32>
    %c0_3 = arith.constant 0 : index
    %c0_4 = arith.constant 0 : index
    %c0_5 = arith.constant 0 : index
    %5 = vector.load %arg1[%c0_3, %c0_4, %c0_5] : memref<1x8x128xf32, #tpu.memory_space<vmem>>, vector<1x8x128xf32>
    %6 = vector.broadcast %4 : vector<1x1x1xf32> to vector<1x8x128xf32>
    %7 = arith.subf %5, %6 : vector<1x8x128xf32>
    %8 = arith.mulf %7, %7 : vector<1x8x128xf32>
    %cst_6 = arith.constant dense<0.000000e+00> : vector<1xf32>
    %9 = vector.multi_reduction <add>, %8, %cst_6 [1, 2] : vector<1x8x128xf32> to vector<1xf32>
    %10 = vector.shape_cast %9 : vector<1xf32> to vector<1x1x1xf32>
    %cst_7 = arith.constant 9.765625E-4 : f32
    %11 = vector.broadcast %cst_7 : f32 to vector<1x1x1xf32>
    %12 = arith.mulf %10, %11 : vector<1x1x1xf32>
    %cst_8 = arith.constant 9.99999974E-6 : f32
    %13 = vector.broadcast %cst_8 : f32 to vector<1x1x1xf32>
    %14 = arith.addf %12, %13 : vector<1x1x1xf32>
    %15 = math.rsqrt %14 : vector<1x1x1xf32>
    %c0_9 = arith.constant 0 : index
    %c0_10 = arith.constant 0 : index
    %c0_11 = arith.constant 0 : index
    %16 = vector.load %arg1[%c0_9, %c0_10, %c0_11] : memref<1x8x128xf32, #tpu.memory_space<vmem>>, vector<1x8x128xf32>
    %17 = vector.broadcast %4 : vector<1x1x1xf32> to vector<1x8x128xf32>
    %18 = arith.subf %16, %17 : vector<1x8x128xf32>
    %19 = vector.broadcast %15 : vector<1x1x1xf32> to vector<1x8x128xf32>
    %20 = arith.mulf %18, %19 : vector<1x8x128xf32>
    %c0_12 = arith.constant 0 : index
    %c0_13 = arith.constant 0 : index
    %c0_14 = arith.constant 0 : index
    %21 = vector.load %arg2[%c0_12, %c0_13, %c0_14] : memref<1x8x128xf32, #tpu.memory_space<vmem>>, vector<1x8x128xf32>
    %22 = arith.mulf %20, %21 : vector<1x8x128xf32>
    %c0_15 = arith.constant 0 : index
    %c0_16 = arith.constant 0 : index
    %c0_17 = arith.constant 0 : index
    %23 = vector.load %arg3[%c0_15, %c0_16, %c0_17] : memref<1x8x128xf32, #tpu.memory_space<vmem>>, vector<1x8x128xf32>
    %24 = arith.addf %22, %23 : vector<1x8x128xf32>
    %c0_18 = arith.constant 0 : index
    %c0_19 = arith.constant 0 : index
    %c0_20 = arith.constant 0 : index
    %25 = vector.load %arg4[%c0_18, %c0_19, %c0_20] : memref<1x8x128xf32, #tpu.memory_space<vmem>>, vector<1x8x128xf32>
    tpu.vector_store %arg4[%c0_18, %c0_19, %c0_20], %24 {strides = array<i32>} : memref<1x8x128xf32, #tpu.memory_space<vmem>>, vector<1x8x128xf32>,
    return
  }
  func.func @transform_0(%arg0: i32) -> (i32, i32, i32) {
    %c0_i32 = arith.constant 0 : i32
    %c0_i32_0 = arith.constant 0 : i32
    %c0_i32_1 = arith.constant 0 : i32
    return %arg0, %c0_i32, %c0_i32_0 : i32, i32, i32
  }
  func.func @transform_1(%arg0: i32) -> (i32, i32, i32) {
    %c0_i32 = arith.constant 0 : i32
    %c0_i32_0 = arith.constant 0 : i32
    %c0_i32_1 = arith.constant 0 : i32
    %c0_i32_2 = arith.constant 0 : i32
    return %c0_i32, %c0_i32_0, %c0_i32_1 : i32, i32, i32
  }
  func.func @transform_2(%arg0: i32) -> (i32, i32, i32) {
    %c0_i32 = arith.constant 0 : i32
    %c0_i32_0 = arith.constant 0 : i32
    %c0_i32_1 = arith.constant 0 : i32
    %c0_i32_2 = arith.constant 0 : i32
    return %c0_i32, %c0_i32_0, %c0_i32_1 : i32, i32, i32
  }
  func.func @transform_3(%arg0: i32) -> (i32, i32, i32) {
    %c0_i32 = arith.constant 0 : i32
    %c0_i32_0 = arith.constant 0 : i32
    %c0_i32_1 = arith.constant 0 : i32
    return %arg0, %c0_i32, %c0_i32_0 : i32, i32, i32
  }
}

</mosaic_0001>

<bundles_post_ra>
// kernel: tpu_custom_call.1
= control target key start
LH: loop header
LB: loop body
LE: loop exit
PB: predicated region body
PF: predicated region fallthrough
CT: control target
= control target key end

     0   :  { %8 = vsyncpa [#allocation3], 0  ;;  %s839_s0 = inlined_call_operand.hbm [shape: f32[2,8,128], index: 0, kind: input, shape index: {}]   ;;  %s840_s1 = inlined_call_operand.hbm [shape: f32[1,8,128], index: 1, kind: input, shape index: {}]   ;;  %s841_s2 = inlined_call_operand.hbm [shape: f32[1,8,128], index: 2, kind: input, shape index: {}]   ;;  %s842_s3 = inlined_call_operand.hbm [shape: f32[2,8,128], index: 3, kind: output, shape index: {}]  }
   0x1   :  { %10 = vsyncpa [#allocation3 + $0x1], 0 }
   0x2   :  { %11 = vsyncpa [#allocation6], 0 }
   0x3   :  { %12 = vsyncpa [#allocation4], 0 }
   0x4   :  { %14 = vsyncpa [#allocation4 + $0x1], 0  ;;  %s610_s12 = smov 0   ;;  %s612_s13 = smov 0  }
   0x5   :  { %s614_s14 = smov 0   ;;  %s616_s15 = smov 0  }
   0x6 LB: > { %s631_s16 = sadd.s32 4294967295, %s584_s15   ;;  %s343_s17 = sadd.s32 4294967294, %s584_s15   ;;  %s584_s15 = sphi %s616_s15, %s862_s15   ;;  %s580_s14 = sphi %s614_s14, %s861_s14   ;;  %s576_s13 = sphi %s612_s13, %s860_s13   ;;  %s572_s12 = sphi %s610_s12, %s859_s12  }
   0x7   : > { %p40_p0 = scmp.ne.s32.totalorder %s576_s13, %s572_s12  ;;  %p843_p1 = scmp.eq.s32.totalorder %s631_s16, 0 }
   0x8   : > { %p112_p3 = scmp.eq.s32.totalorder %s343_s17, 1  ;;  %p344_p5 = scmp.ge.s32.totalorder %s584_s15, 1 }
   0x9   : > { %p640_p4 = por %p843_p1, %p40_p0  ;;  %p119_p7 = scmp.lt.s32.totalorder %s584_s15, 3 }
   0xa   : > { %p645_p6 = por %p112_p3, %p40_p0  ;;  %s586_s21 = smov [#allocation5]  }
   0xb   : > { %s846_s18 = scalar_select %p640_p4, 1, 0 }
   0xc   : > { %s847_s19 = scalar_select %p645_p6, 1, 0 }
   0xd   : > { %p650_p8 = pnand %p344_p5, %p119_p7  ;;  %s132_s22 = sshll.u32 %s586_s21, 4  ;;  %s133_s22 = int_to_ptr.vmem [resolvable:$true] %s132_s22 }
   0xe   : > { %s587_s23 = smov [#allocation7]   ;;  %s666_s26 = sadd.s32 1, %s584_s15  }
   0xf   : > { %s848_s20 = scalar_select %p650_p8, 1, 0 }
  0x10   : > { %p371_p10 = pneg %p650_p8  ;;  %s143_s24 = sshll.u32 %s587_s23, 4  ;;  %s663_s24 = int_to_ptr.vmem [resolvable:$true] %s143_s24 }
  0x11   : > { %s24_s27 = ssub.s32 %s584_s15, %s666_s26  ;;  %s428_s30 = scalar_lea.hbm %s840_s1, 128 }
  0x12   : > { %p659_p11 = pnand %p371_p10, %p843_p1  ;;  %p429_p12 = scmp.ne.s32.totalorder %s840_s1, %s428_s30 }
  0x13   : > { %p435_p5 = scmp.lt.u32.totalorder %s428_s30, %s840_s1 }
  0x14   : > { %p430_p13 = pneg %p659_p11 }
  0x16   : > { %p431_p0 = pnand %p430_p13, %p429_p12 }
  0x18   : > { %p432_p3 = pneg %p431_p0 }
  0x1a   : > { %p437_p7 = pnand %p435_p5, %p432_p3 }
  0x1c   : > { %440 = shalt.err (!%p437_p7)
}
  0x1d   : > { %s441_s8 = scalar_lea.vmem %s133_s22, 128  ;;  %p449_p2 = scmp.lt.s32.totalorder %s133_s22, %s133_s22 }
  0x1e   : > { %p442_p10 = scmp.ne.s32.totalorder %s133_s22, %s441_s8  ;;  %p450_p6 = scmp.lt.s32.totalorder %s441_s8, %s441_s8 }
  0x20   : > { %p444_p9 = pnand %p442_p10, %p430_p13  ;;  %p451_p4 = por %p450_p6, %p449_p2 }
  0x22   : > { %p445_p1 = pneg %p444_p9 }
  0x24   : > { %p452_p8 = pnand %p451_p4, %p445_p1 }
  0x26   : > { %455 = shalt.err (!%p452_p8)
}
  0x27   : > { %374 = dma.hbm_to_vmem [thread:$0]  (!%p659_p11), %s840_s1, 128, %s133_s22, [#allocation6]  }
  0x28   : > { %s456_s21 = scalar_lea.hbm %s841_s2, 128 }
  0x29   : > { %p457_p9 = scmp.ne.s32.totalorder %s841_s2, %s456_s21  ;;  %p463_p4 = scmp.lt.u32.totalorder %s456_s21, %s841_s2 }
  0x2b   : > { %p459_p2 = pnand %p457_p9, %p430_p13 }
  0x2d   : > { %p460_p1 = pneg %p459_p2 }
  0x2f   : > { %p465_p6 = pnand %p463_p4, %p460_p1 }
  0x31   : > { %468 = shalt.err (!%p465_p6)
}
  0x32   : > { %s469_s22 = scalar_lea.vmem %s663_s24, 128  ;;  %p477_p3 = scmp.lt.s32.totalorder %s663_s24, %s663_s24 }
  0x33   : > { %p470_p8 = scmp.ne.s32.totalorder %s663_s24, %s469_s22  ;;  %p478_p5 = scmp.lt.s32.totalorder %s469_s22, %s469_s22 }
  0x35   : > { %p472_p12 = pnand %p470_p8, %p430_p13  ;;  %p479_p7 = por %p478_p5, %p477_p3 }
  0x37   : > { %p473_p0 = pneg %p472_p12 }
  0x39   : > { %p480_p10 = pnand %p479_p7, %p473_p0 }
  0x3b   : > { %483 = shalt.err (!%p480_p10)
}
  0x3c   : > { %377 = dma.hbm_to_vmem [thread:$0]  (!%p659_p11), %s841_s2, 128, %s663_s24, [#allocation6]  }
  0x3d   : > { %p25_p13 = scmp.eq.s32.totalorder %s24_s27, 0  ;;  %s27_s6 = sadd.s32 1, %s580_s14 }
  0x3e   : > { %p34_p9 = scmp.ne.s32.totalorder %s580_s14, %s576_s13  ;;  %p35_p2 = scmp.eq.s32.totalorder %s584_s15, 0 }
  0x3f   : > { %s725_s25 = scalar_select %p25_p13, %s580_s14, %s27_s6  }
  0x40   : > { %p36_p1 = por %p35_p2, %p34_p9  ;;  %p850_p4 = scmp.eq.s32.totalorder %s631_s16, 1 }
  0x41   : > { %p388_p8 = scmp.lt.s32.totalorder %s584_s15, 2  ;;  %s154_s8 = sand.u32 1, %s580_s14  }
  0x42   : > { %p729_p6 = por %p850_p4, %p34_p9  ;;  %s348_s9 = sshll.u32 %s154_s8, 3 }
  0x43   : > { %s349_s10 = sshll.u32 %s584_s15, 7  ;;  %s158_s27 = scalar_lea.vmem [#allocation2], %s348_s9 }
  0x44   : > { %s739_s24 = scalar_lea.hbm %s839_s0, %s349_s10  ;;  %s165_s21 = sshll.u32 %s158_s27, 4  ;;  %s741_s21 = int_to_ptr.vmem [resolvable:$true] %s165_s21 }
  0x45   : > { %p743_p11 = pnand %p388_p8, %p36_p1  ;;  %s155_s28 = scalar_lea.sflag [#allocation3], %s154_s8 }
  0x46   : > { %s484_s29 = scalar_lea.hbm %s739_s24, 128  ;;  %s489_s4 = scalar_lea.hbm %s839_s0, 256 }
  0x47   : > { %p485_p12 = scmp.ne.s32.totalorder %s739_s24, %s484_s29  ;;  %p486_p0 = pneg %p743_p11 }
  0x48   : > { %p490_p7 = scmp.lt.u32.totalorder %s739_s24, %s839_s0  ;;  %p491_p10 = scmp.lt.u32.totalorder %s489_s4, %s484_s29 }
  0x49   : > { %p487_p3 = pnand %p486_p0, %p485_p12  ;;  %p493_p9 = scmp.lt.u32.totalorder %s484_s29, %s739_s24 }
  0x4a   : > { %p492_p13 = por %p491_p10, %p490_p7 }
  0x4b   : > { %p488_p5 = pneg %p487_p3 }
  0x4c   : > { %p494_p2 = por %p493_p9, %p492_p13 }
  0x4e   : > { %p495_p1 = pnand %p494_p2, %p488_p5 }
  0x50   : > { %498 = shalt.err (!%p495_p1)
}
  0x51   : > { %s499_s8 = scalar_lea.vmem %s741_s21, 128  ;;  %s588_s9 = smov [#allocation2]  }
  0x52   : > { %p500_p4 = scmp.ne.s32.totalorder %s741_s21, %s499_s8  ;;  %s504_s10 = sshll.u32 %s588_s9, 4  ;;  %s505_s10 = int_to_ptr.vmem [resolvable:$false] %s504_s10 }
  0x53   : > { %s506_s11 = scalar_lea.vmem %s505_s10, 256  ;;  %p507_p3 = scmp.lt.s32.totalorder %s741_s21, %s505_s10 }
  0x54   : > { %p502_p8 = pnand %p500_p4, %p486_p0  ;;  %p508_p7 = scmp.lt.s32.totalorder %s506_s11, %s499_s8 }
  0x56   : > { %p503_p12 = pneg %p502_p8  ;;  %p509_p10 = por %p508_p7, %p507_p3 }
  0x58   : > { %p510_p13 = pnand %p509_p10, %p503_p12 }
  0x5a   : > { %513 = shalt.err (!%p510_p13)
}
  0x5b   : > { %381 = dma.hbm_to_vmem [thread:$0]  (!%p743_p11), %s739_s24, 128, %s741_s21, %s155_s28  }
  0x5c   : > { %p853_p5 = scmp.ne.s32.totalorder %s848_s20, 0 }
  0x5d   : > { %s775_s17 = sand.u32 (!%p853_p5), 1, %s576_s13   ;;  %p854_p0 = scmp.ne.s32.totalorder (!%p853_p5), %s846_s18, 0 }
  0x5e   : > { %174 = sbr.rel (%p853_p5) target bundleno = 455 (0x1c7), region = 32  ;;  %s351_s27 = sshll.u32 (!%p853_p5), %s775_s17, 3 }
  0x5f   : > { %s177_s29 = scalar_lea.sflag (!%p853_p5), [#allocation3], %s775_s17  ;;  %s180_s30 = scalar_lea.vmem (!%p853_p5), [#allocation2], %s351_s27 }
  0x65   : > { %559 = dma.done.wait (%p854_p0), %s177_s29, 128  }
  0x66   : > { %561 = vsyncadd (%p854_p0), %s177_s29, 4294967168  ;;  %p855_p11 = scmp.eq.s32.totalorder %s631_s16, 0 }
  0x68   : > { %563 = dma.done.wait (%p855_p11), [#allocation6], 256   ;;  %p856_p9 = pmov %p855_p11 }
  0x69   : > { %v211_v0 = vld [vmem:[%s180_s30] sm:$0xff]  ;;  %v235_v21 = vld [vmem:[#allocation5] sm:$0xff]  ;;  %v237_v23 = vld [vmem:[#allocation7] sm:$0xff]  ;;  %s356_s18 = sshll.u32 %s631_s16, 7  ;;  %s210_s20 = scalar_lea.vmem [#allocation8], %s351_s27 }
  0x6a   : > { %565 = vsyncadd (%p856_p9), [#allocation6], 4294967040  ;;  %212 = vadd.xlane.f32.xlu0 %v211_v0  ;;  %s254_s24 = sshll.u32 %s210_s20, 4  ;;  %s795_s28 = scalar_lea.hbm %s842_s3, %s356_s18  ;;  %s797_s24 = int_to_ptr.vmem [resolvable:$true] %s254_s24 }
  0x6b   : > { %s241_s22 = scalar_lea.sflag [#allocation4], %s775_s17  ;;  %s514_s4 = scalar_lea.vmem %s797_s24, 128 }
  0x6c   : > { %p515_p2 = scmp.ne.s32.totalorder %s797_s24, %s514_s4  ;;  %s589_s16 = smov [#allocation8]  }
  0x6d   : > { %s518_s5 = sshll.u32 %s589_s16, 4  ;;  %s519_s5 = int_to_ptr.vmem [resolvable:$false] %s518_s5 }
  0x6e   : > { %p516_p1 = pnand %p515_p2, %p729_p6  ;;  %s520_s6 = scalar_lea.vmem %s519_s5, 256 }
  0x6f   : > { %p521_p8 = scmp.lt.s32.totalorder %s797_s24, %s519_s5  ;;  %p522_p12 = scmp.lt.s32.totalorder %s520_s6, %s514_s4 }
  0x70   : > { %p517_p4 = pneg %p516_p1 }
  0x71   : > { %p523_p3 = por %p522_p12, %p521_p8 }
  0x73   : > { %p524_p7 = pnand %p523_p3, %p517_p4 }
  0xf7   : > { %v213_v1 = vpop.xlane.xlu0 %212 }
  0xf8   : > { %v214_v2 = vrot.slane %v213_v1, 4 }
  0xfa   : > { %v215_v3 = vadd.f32 %v214_v2, %v213_v1 }
  0xfc   : > { %v216_v4 = vrot.slane %v215_v3, 2 }
  0xfe   : > { %v217_v5 = vadd.f32 %v216_v4, %v215_v3 }
 0x100   : > { %v218_v6 = vrot.slane %v217_v5, 1 }
 0x102   : > { %v219_v7 = vadd.f32 %v218_v6, %v217_v5 }
 0x104   : > { %v220_v8 = vmul.f32 0.0009765625, %v219_v7 }
 0x106   : > { %v221_v9 = vsub.f32 %v211_v0, %v220_v8 }
 0x108   : > { %v222_v10 = vmul.f32 %v221_v9, %v221_v9 }
 0x10a   : > { %223 = vadd.xlane.f32.xlu0 %v222_v10 }
 0x197   : > { %v224_v11 = vpop.xlane.xlu0 %223 }
 0x198   : > { %v225_v12 = vrot.slane %v224_v11, 4 }
 0x19a   : > { %v226_v13 = vadd.f32 %v225_v12, %v224_v11 }
 0x19c   : > { %v227_v14 = vrot.slane %v226_v13, 2 }
 0x19e   : > { %v228_v15 = vadd.f32 %v227_v14, %v226_v13 }
 0x1a0   : > { %v229_v16 = vrot.slane %v228_v15, 1 }
 0x1a2   : > { %v230_v17 = vadd.f32 %v229_v16, %v228_v15 }
 0x1a4   : > { %v231_v18 = vmul.f32 0.0009765625, %v230_v17 }
 0x1a6   : > { %v232_v19 = vadd.f32 1e-05, %v231_v18 }
 0x1a8   : > { %426 = vrsqrt.f32 %v232_v19 }
 0x1b2   : > { %v427_v20 = vpop.eup %426 }
 0x1b3   : > { %v234_v22 = vmul.f32 %v427_v20, %v221_v9 }
 0x1b5   : > { %v236_v24 = vmul.f32 %v235_v21, %v234_v22 }
 0x1b7   : > { %v238_v25 = vadd.f32 %v237_v23, %v236_v24 }
 0x1b9   : > { %239 = vst [vmem:[%s210_s20] sm:$0xff] %v238_v25 }
 0x1ba   : > { %527 = shalt.err (!%p524_p7)
}
 0x1bb   : > { %s528_s8 = scalar_lea.hbm %s795_s28, 128  ;;  %s532_s11 = scalar_lea.hbm %s842_s3, 256 }
 0x1bc   : > { %p529_p10 = scmp.ne.s32.totalorder %s795_s28, %s528_s8  ;;  %p533_p0 = scmp.lt.u32.totalorder %s795_s28, %s842_s3 }
 0x1bd   : > { %p534_p11 = scmp.lt.u32.totalorder %s532_s11, %s528_s8  ;;  %p536_p2 = scmp.lt.u32.totalorder %s528_s8, %s795_s28 }
 0x1be   : > { %p530_p13 = pnand %p529_p10, %p729_p6 }
 0x1bf   : > { %p535_p9 = por %p534_p11, %p533_p0 }
 0x1c0   : > { %p531_p5 = pneg %p530_p13 }
 0x1c1   : > { %p537_p1 = por %p536_p2, %p535_p9 }
 0x1c3   : > { %p538_p4 = pnand %p537_p1, %p531_p5 }
 0x1c5   : > { %541 = shalt.err (!%p538_p4)
}
 0x1c6   : > { %369 = dma.vmem_to_hbm [thread:$0]  (%p729_p6), %s797_s24, 128, %s795_s28, %s241_s22  }
 0x1c7 PF: > { %s266_s29 = sand.u32 1, %s572_s12   ;;  %p857_p8 = scmp.ne.s32.totalorder %s847_s19, 0 }
 0x1c8   : > { %p858_p12 = scmp.ge.s32.totalorder %s584_s15, 2  ;;  %s267_s30 = scalar_lea.sflag [#allocation4], %s266_s29 }
 0x1ca   : > { %p383_p3 = pnand %p858_p12, %p857_p8 }
 0x1cc   : > { %567 = dma.done.wait (!%p383_p3), %s267_s30, 128  }
 0x1cd   : > { %569 = vsyncadd (!%p383_p3), %s267_s30, 4294967168  ;;  %p17_p7 = scmp.ge.s32.totalorder %s666_s26, 4   ;;  %s859_s12 = smov %s576_s13 }
 0x1ce   : > { %s860_s13 = smov %s580_s14  ;;  %s861_s14 = smov %s725_s25 }
 0x1cf   : > { %s862_s15 = smov %s666_s26  ;;  %19 = sbr.rel (!%p17_p7) target bundleno = 6 (0x6), region = 85 }
 0x1d6   :  { %272 = vsyncpa [#allocation3], 1 }
 0x1d7   :  { %274 = vsyncpa [#allocation3 + $0x1], 1 }
 0x1d8   :  { %275 = vsyncpa [#allocation6], 1 }
 0x1d9   :  { %276 = vsyncpa [#allocation4], 1 }
 0x1da   :  { %278 = vsyncpa [#allocation4 + $0x1], 1 }

</bundles_post_ra>
